<compile_context>
chip_gen: v5e
topology: v5e:2x2
jax: 0.10.0
libtpu: 0.0.40
codegen_flags: <defaults>
</compile_context>

<pallas_src>
import numpy as np
import jax
import jax.numpy as jnp
from jax import lax
from jax.experimental import pallas as pl
from jax.experimental.pallas import tpu as pltpu


# ----------------------------------------------------------------------------
# Pallas kernel: cosine similarity along dim 0 (embedding dim)
# ----------------------------------------------------------------------------
def _cosine_edge_kernel(e1_ref, e2_ref, out_ref):
    # e1_ref, e2_ref : (D, TB)   out_ref : (1, TB)
    eps = jnp.float32(1e-8)

    # Upcast once after load (bf16 ingest path); all accumulation in f32.
    e1 = e1_ref[...].astype(jnp.float32)                              # (D, TB)
    e2 = e2_ref[...].astype(jnp.float32)                              # (D, TB)

    num = jnp.sum(e1 * e2, axis=0, keepdims=True)                     # (1, TB)
    n1sq = jnp.sum(e1 * e1, axis=0, keepdims=True)                    # (1, TB)
    n2sq = jnp.sum(e2 * e2, axis=0, keepdims=True)                    # (1, TB)

    # cos = num / max(||e1||*||e2||, eps) == num * rsqrt(max(n1sq*n2sq, eps^2))
    denom_sq = jnp.maximum(n1sq * n2sq, eps * eps)
    out_ref[...] = num * lax.rsqrt(denom_sq)


# ----------------------------------------------------------------------------
# Hardware query (generation-aware tiling).  Falls back to the conservative
# v7x-sized VMEM if the query is unavailable.
# ----------------------------------------------------------------------------
def _tpu_vmem_bytes():
    try:
        info = pltpu.get_tpu_info()
        v = getattr(info, "vmem_capacity_bytes", None)
        if v:
            return int(v)
    except Exception:
        pass
    return 64 << 20  # conservative (v7x-sized); never over-asks VMEM


def _round_up(x, m):
    return ((x + m - 1) // m) * m


# ----------------------------------------------------------------------------
# Tile sizing: largest lane tile that double-buffers inside the VMEM budget.
#   multi_core (v7x): keep >= 2 grid steps and prefer an even step count.
#   single core (v5e/v6e): one full-width block when it fits.
# ----------------------------------------------------------------------------
def _choose_batch_tile(D, B, itemsize, *, vmem_budget_bytes, multi_core,
                       max_tile=8192):
    buffer_count = 2
    sublane = 8 * (4 // itemsize)              # 8 (f32) / 16 (bf16)
    d_pad = _round_up(D, sublane)              # physical sublane-padded rows
    per_lane = 2 * buffer_count * d_pad * itemsize

    tb = (vmem_budget_bytes // per_lane) // 128 * 128
    tb = max(128, min(tb, max_tile))

    b128 = _round_up(B, 128)
    tb = min(tb, b128)                         # don't over-size for small B

    if multi_core and b128 >= 256:
        # Keep >= 2 grid steps so both TensorCores get work.
        tb = min(tb, _round_up(pl.cdiv(b128, 2), 128))

    tb = max(tb, 128)

    if multi_core:
        # Prefer an EVEN number of grid steps (balanced split across 2 TCs).
        grid_n = pl.cdiv(B, tb)
        attempts = 0
        while grid_n > 1 and grid_n % 2 == 1 and tb > 128 and attempts < 8:
            tb -= 128
            grid_n = pl.cdiv(B, tb)
            attempts += 1

    return tb


# ----------------------------------------------------------------------------
# Wrapper
# ----------------------------------------------------------------------------
def cosine_edge_forward(embeds1, embeds2, rel=None, *, batch_tile=None):
    """embeds1, embeds2: (D, B) f32 or bf16 -> (B,) f32.  `rel` is ignored."""
    del rel  # CosineEdgeDecoder does not distinguish edge types.
    D, B = embeds1.shape
    assert embeds2.shape == (D, B)
    itemsize = jnp.dtype(embeds1.dtype).itemsize
    buffer_count = 2

    vmem_phys = _tpu_vmem_bytes()
    multi_core = vmem_phys < (100 << 20)       # v7x-like: 64 MiB VMEM, 2 TCs
    vmem_budget = (24 << 20) if multi_core else (48 << 20)

    if batch_tile is None:
        tb = _choose_batch_tile(D, B, itemsize,
                                vmem_budget_bytes=vmem_budget,
                                multi_core=multi_core)
    else:
        tb = batch_tile

    grid_n = pl.cdiv(B, tb)

    # VMEM limit from the *padded* tile footprint: D rounded to the sublane
    # multiple for the inputs; the (1, tb) f32 output tile is physically (8, tb).
    sublane = 8 * (4 // itemsize)
    d_pad = _round_up(D, sublane)
    vmem_needed = (2 * buffer_count * d_pad * tb * itemsize
                   + buffer_count * 8 * tb * 4)
    vmem_cap = min(int(vmem_phys * 3 // 4), 104 << 20)   # 48 MiB on v7x, ~96 MiB on v5e/v6e
    vmem_limit = int(min(max(2 * vmem_needed, 32 << 20), vmem_cap))

    emb_spec = pl.BlockSpec((D, tb), lambda i: (0, i))

    # Advisory cost hint for XLA scheduling around this HBM-bound custom call.
    cost = pl.CostEstimate(
        flops=6 * D * B,
        transcendentals=B,
        bytes_accessed=2 * D * B * itemsize + 4 * B,
    )

    # NOTE: no jnp.pad -- the last block is partial; Pallas clips the DMA and
    # the writeback, so any garbage in the tail lanes stays lane-local and
    # never reaches the (1, B) output.
    out = pl.pallas_call(
        _cosine_edge_kernel,
        out_shape=jax.ShapeDtypeStruct((1, B), jnp.float32),
        grid_spec=pltpu.PrefetchScalarGridSpec(
            num_scalar_prefetch=0,
            grid=(grid_n,),
            in_specs=[emb_spec, emb_spec],
            out_specs=pl.BlockSpec((1, tb), lambda i: (0, i)),
        ),
        compiler_params=pltpu.CompilerParams(
            dimension_semantics=("parallel",),
            vmem_limit_bytes=vmem_limit),
        cost_estimate=cost,
    )(embeds1, embeds2)
    return out[0]  # (B,)


# ----------------------------------------------------------------------------
# Pure-JAX reference matching the PyTorch forward
# ----------------------------------------------------------------------------
def reference_forward(embeds1, embeds2):
    x = embeds1.astype(jnp.float32)
    y = embeds2.astype(jnp.float32)
    num = jnp.sum(x * y, axis=0)
    denom = jnp.maximum(
        jnp.linalg.norm(x, axis=0) * jnp.linalg.norm(y, axis=0), 1e-8)
    return num / denom


if __name__ == "__main__":
    D = 32     # embedding dim
    B = 300    # batch; deliberately NOT a multiple of 128 (exercises the
               # partial last block -- no wrapper-side padding pass)

    k1, k2 = jax.random.split(jax.random.PRNGKey(0))
    embeds1 = jax.random.normal(k1, (D, B), dtype=jnp.float32)
    embeds2 = jax.random.normal(k2, (D, B), dtype=jnp.float32)
    rel = ("protein", "targets", "disease")   # ignored by CosineEdgeDecoder

    # float32 path
    out = jax.block_until_ready(cosine_edge_forward(embeds1, embeds2, rel))
    ref = reference_forward(embeds1, embeds2)
    np.testing.assert_allclose(np.asarray(out), np.asarray(ref),
                               rtol=1e-5, atol=1e-5)

    # bf16 ingest path (recommended default: halves HBM traffic; f32 accumulation)
    e1_bf = embeds1.astype(jnp.bfloat16)
    e2_bf = embeds2.astype(jnp.bfloat16)
    out_bf = jax.block_until_ready(cosine_edge_forward(e1_bf, e2_bf, rel))
    ref_bf = reference_forward(e1_bf, e2_bf)
    np.testing.assert_allclose(np.asarray(out_bf), np.asarray(ref_bf),
                               rtol=2e-2, atol=2e-2)

    print("KERNEL_OK")
</pallas_src>

<mosaic_0001>
module attributes {stable_mosaic.version = 11 : i64} {
  func.func @_cosine_edge_kernel(%arg0: i32, %arg1: memref<32x256xf32, #tpu.memory_space<vmem>>, %arg2: memref<32x256xf32, #tpu.memory_space<vmem>>, %arg3: memref<1x256xf32, #tpu.memory_space<vmem>>) attributes {dimension_semantics = [#tpu.dimension_semantics<parallel>], iteration_bounds = array<i64: 2>, scalar_prefetch = 0 : i64, scratch_operands = 0 : i64, tpu.core_type = #tpu.core_type<tc>, window_params = [{transform_indices = @transform_0, window_bounds = array<i64: 32, 256>}, {transform_indices = @transform_1, window_bounds = array<i64: 32, 256>}, {transform_indices = @transform_2, window_bounds = array<i64: 1, 256>}]} {
    %c0 = arith.constant 0 : index
    %c0_0 = arith.constant 0 : index
    %0 = vector.load %arg1[%c0, %c0_0] : memref<32x256xf32, #tpu.memory_space<vmem>>, vector<32x256xf32>
    %c0_1 = arith.constant 0 : index
    %c0_2 = arith.constant 0 : index
    %1 = vector.load %arg2[%c0_1, %c0_2] : memref<32x256xf32, #tpu.memory_space<vmem>>, vector<32x256xf32>
    %2 = arith.mulf %0, %1 : vector<32x256xf32>
    %cst = arith.constant dense<0.000000e+00> : vector<256xf32>
    %3 = vector.multi_reduction <add>, %2, %cst [0] : vector<32x256xf32> to vector<256xf32>
    %4 = vector.shape_cast %3 : vector<256xf32> to vector<1x256xf32>
    %5 = arith.mulf %0, %0 : vector<32x256xf32>
    %cst_3 = arith.constant dense<0.000000e+00> : vector<256xf32>
    %6 = vector.multi_reduction <add>, %5, %cst_3 [0] : vector<32x256xf32> to vector<256xf32>
    %7 = vector.shape_cast %6 : vector<256xf32> to vector<1x256xf32>
    %8 = arith.mulf %1, %1 : vector<32x256xf32>
    %cst_4 = arith.constant dense<0.000000e+00> : vector<256xf32>
    %9 = vector.multi_reduction <add>, %8, %cst_4 [0] : vector<32x256xf32> to vector<256xf32>
    %10 = vector.shape_cast %9 : vector<256xf32> to vector<1x256xf32>
    %11 = arith.mulf %7, %10 : vector<1x256xf32>
    %cst_5 = arith.constant 9.99999993E-9 : f32
    %cst_6 = arith.constant 9.99999993E-9 : f32
    %12 = arith.mulf %cst_5, %cst_6 : f32
    %13 = vector.broadcast %12 : f32 to vector<1x256xf32>
    %14 = arith.maximumf %11, %13 : vector<1x256xf32>
    %15 = math.rsqrt %14 : vector<1x256xf32>
    %16 = arith.mulf %4, %15 : vector<1x256xf32>
    %c0_7 = arith.constant 0 : index
    %c0_8 = arith.constant 0 : index
    %17 = vector.load %arg3[%c0_7, %c0_8] : memref<1x256xf32, #tpu.memory_space<vmem>>, vector<1x256xf32>
    tpu.vector_store %arg3[%c0_7, %c0_8], %16 {strides = array<i32>} : memref<1x256xf32, #tpu.memory_space<vmem>>, vector<1x256xf32>,
    return
  }
  func.func @transform_0(%arg0: i32) -> (i32, i32) {
    %c0_i32 = arith.constant 0 : i32
    %c0_i32_0 = arith.constant 0 : i32
    return %c0_i32, %arg0 : i32, i32
  }
  func.func @transform_1(%arg0: i32) -> (i32, i32) {
    %c0_i32 = arith.constant 0 : i32
    %c0_i32_0 = arith.constant 0 : i32
    return %c0_i32, %arg0 : i32, i32
  }
  func.func @transform_2(%arg0: i32) -> (i32, i32) {
    %c0_i32 = arith.constant 0 : i32
    %c0_i32_0 = arith.constant 0 : i32
    return %c0_i32, %arg0 : i32, i32
  }
}

</mosaic_0001>

<bundles_post_ra>
// kernel: tpu_custom_call.1
= control target key start
LH: loop header
LB: loop body
LE: loop exit
PB: predicated region body
PF: predicated region fallthrough
CT: control target
= control target key end

     0   :  { %7 = vsyncpa [#allocation3], 0  ;;  %s986_s0 = inlined_call_operand.hbm [shape: f32[32,300], index: 0, kind: input, shape index: {}]   ;;  %s987_s1 = inlined_call_operand.hbm [shape: f32[32,300], index: 1, kind: input, shape index: {}]   ;;  %s988_s2 = inlined_call_operand.hbm [shape: f32[1,300], index: 2, kind: output, shape index: {}]  }
   0x1   :  { %9 = vsyncpa [#allocation3 + $0x1], 0 }
   0x2   :  { %10 = vsyncpa [#allocation6], 0 }
   0x3   :  { %12 = vsyncpa [#allocation6 + $0x1], 0 }
   0x4   :  { %13 = vsyncpa [#allocation4], 0 }
   0x5   :  { %15 = vsyncpa [#allocation4 + $0x1], 0  ;;  %s746_s9 = smov 0   ;;  %s748_s10 = smov 0  }
   0x6   :  { %s750_s11 = smov 0   ;;  %s752_s12 = smov 0  }
   0x7 LB: > { %s767_s13 = sadd.s32 4294967295, %s722_s12   ;;  %s481_s14 = sadd.s32 4294967294, %s722_s12   ;;  %s722_s12 = sphi %s752_s12, %s1001_s12   ;;  %s718_s11 = sphi %s750_s11, %s1000_s11   ;;  %s714_s10 = sphi %s748_s10, %s999_s10   ;;  %s710_s9 = sphi %s746_s9, %s998_s9  }
   0x8   : > { %s771_s15 = sadd.s32 1, %s722_s12   ;;  %s28_s16 = sadd.s32 1, %s718_s11 }
   0x9   : > { %s25_s17 = ssub.s32 %s722_s12, %s771_s15  ;;  %p35_p0 = scmp.ne.s32.totalorder %s718_s11, %s714_s10 }
   0xa   : > { %p26_p1 = scmp.eq.s32.totalorder %s25_s17, 0  ;;  %p36_p2 = scmp.eq.s32.totalorder %s722_s12, 0 }
   0xb   : > { %p41_p3 = scmp.ne.s32.totalorder %s714_s10, %s710_s9  ;;  %p42_p4 = scmp.eq.s32.totalorder %s767_s13, 0 }
   0xc   : > { %s783_s18 = scalar_select %p26_p1, %s718_s11, %s28_s16  }
   0xd   : > { %p785_p5 = por %p36_p2, %p35_p0  ;;  %p789_p6 = por %p42_p4, %p41_p3 }
   0xe   : > { %p91_p7 = scmp.eq.s32.totalorder %s767_s13, 1  ;;  %p97_p8 = scmp.eq.s32.totalorder %s481_s14, 1 }
   0xf   : > { %p989_p11 = scmp.ge.s32.totalorder %s722_s12, 2 }
  0x10   : > { %p794_p9 = por %p91_p7, %p35_p0  ;;  %p798_p10 = por %p97_p8, %p41_p3 }
  0x11   : > { %113 = sbr.rel (%p989_p11) target bundleno = 96 (0x60), region = 16 }
  0x12   : > { %s993_s22 = scalar_select %p798_p10, 1, 0 }
  0x16   : > { %116 = sbr.rel (!%p785_p5) target bundleno = 59 (0x3b), region = 20  ;;  %s117_s23 = sand.u32 (%p785_p5), 1, %s718_s11  }
  0x17   : > { %s485_s24 = sshll.u32 (%p785_p5), %s722_s12, 1  ;;  %s484_s25 = sshll.u32 (%p785_p5), %s117_s23, 6 }
  0x18   : > { %s123_s26 = ssub.s32 (%p785_p5), 3, %s485_s24  ;;  %s812_s30 = scalar_lea.sflag (%p785_p5), [#allocation3], %s117_s23 }
  0x19   : > { %p124_p12 = scmp.lt.s32.totalorder (%p785_p5), %s123_s26, 2  ;;  %s121_s3 = scalar_lea.vmem (%p785_p5), [#allocation2], %s484_s25 }
  0x1b   : > { %s1003_s26 = smov (!%p124_p12, %s123_s26), 2 }
  0x1c   : > { %s486_s27 = sshll.u32 %s1003_s26, 5 }
  0x1d   : > { %s127_s28 = ssub.s32 64, %s486_s27 }
  0x1e   : > { %s128_s29 = sshll.u32 %s127_s28, 4 }
  0x1f   : > { %129 = vsyncadd %s812_s30, %s128_s29  ;;  %p815_p13 = scmp.ne.s32.totalorder %s486_s27, 0  ;;  %s509_s5 = sshll.u32 %s722_s12, 4 }
  0x20   : > { %s132_s8 = scalar_lea.hbm %s986_s0, %s509_s5  ;;  %s489_s14 = sshll.u32 %s1003_s26, 3 }
  0x21   : > { %s135_s16 = sshll.u32 %s132_s8, 4  ;;  %s824_s17 = sshll.u32 %s121_s3, 4  ;;  %s826_s16 = int_to_ptr.hbm [resolvable:$true] %s135_s16  ;;  %s138_s17 = int_to_ptr.vmem [resolvable:$true] %s824_s17 }
  0x22   : > { %s511_s23 = sshll.u32 %s1003_s26, 9  ;;  %s563_s24 = sshra.s32 %s826_s16, 4  ;;  %s564_s24 = int_to_ptr.hbm [resolvable:$true] %s563_s24 }
  0x23   : > { %s565_s25 = sshrl.u32 %s511_s23, 4  ;;  %s574_s3 = scalar_lea.hbm %s986_s0, 96 }
  0x24   : > { %s570_s27 = scalar_lea.hbm %s564_s24, %s565_s25  ;;  %p575_p3 = scmp.lt.s32.totalorder %s564_s24, %s986_s0 }
  0x25   : > { %p571_p0 = scmp.ne.s32.totalorder %s564_s24, %s570_s27  ;;  %p576_p4 = scmp.lt.s32.totalorder %s574_s3, %s570_s27 }
  0x27   : > { %p572_p1 = pnand %p571_p0, %p815_p13  ;;  %p577_p7 = por %p576_p4, %p575_p3 }
  0x29   : > { %p573_p2 = pneg %p572_p1 }
  0x2b   : > { %p578_p8 = pnand %p577_p7, %p573_p2 }
  0x2d   : > { %581 = shalt.err (!%p578_p8)
}
  0x2e   : > { %s582_s7 = sshra.s32 %s138_s17, 4  ;;  %s724_s28 = smov [#allocation2]   ;;  %s583_s7 = int_to_ptr.vmem [resolvable:$true] %s582_s7 }
  0x2f   : > { %s589_s8 = scalar_lea.vmem %s583_s7, %s565_s25  ;;  %s593_s29 = scalar_lea.vmem %s724_s28, 128 }
  0x30   : > { %p590_p12 = scmp.ne.s32.totalorder %s583_s7, %s589_s8  ;;  %p595_p11 = scmp.lt.s32.totalorder %s593_s29, %s589_s8 }
  0x32   : > { %p591_p0 = pnand %p590_p12, %p815_p13 }
  0x34   : > { %p592_p1 = pneg %p591_p0 }
  0x36   : > { %p597_p10 = pnand %p595_p11, %p592_p1 }
  0x38   : > { %600 = shalt.err (!%p597_p10)
}
  0x39   : > { %s725_s24 = smov 384   ;;  %s726_s27 = smov 256  }
  0x3a   : > { %143 = dma.hbm_to_vmem [thread:$0]  (%p815_p13), %s826_s16, %s511_s23, %s138_s17, %s812_s30, %s725_s24, %s726_s27, %s489_s14  }
  0x3b PF: > { %146 = sbr.rel (!%p785_p5) target bundleno = 96 (0x60), region = 24  ;;  %s147_s25 = sand.u32 (%p785_p5), 1, %s718_s11  }
  0x3c   : > { %s493_s3 = sshll.u32 (%p785_p5), %s722_s12, 1  ;;  %s492_s5 = sshll.u32 (%p785_p5), %s147_s25, 6 }
  0x3d   : > { %s153_s6 = ssub.s32 (%p785_p5), 3, %s493_s3  ;;  %s862_s28 = scalar_lea.sflag (%p785_p5), [#allocation6], %s147_s25 }
  0x3e   : > { %p154_p10 = scmp.lt.s32.totalorder (%p785_p5), %s153_s6, 2  ;;  %s151_s26 = scalar_lea.vmem (%p785_p5), [#allocation5], %s492_s5 }
  0x40   : > { %s1005_s6 = smov (!%p154_p10, %s153_s6), 2 }
  0x41   : > { %s494_s7 = sshll.u32 %s1005_s6, 5 }
  0x42   : > { %s157_s4 = ssub.s32 64, %s494_s7 }
  0x43   : > { %s158_s8 = sshll.u32 %s157_s4, 4 }
  0x44   : > { %159 = vsyncadd %s862_s28, %s158_s8  ;;  %p865_p5 = scmp.ne.s32.totalorder %s494_s7, 0  ;;  %s512_s30 = sshll.u32 %s722_s12, 4 }
  0x45   : > { %s162_s17 = scalar_lea.hbm %s987_s1, %s512_s30  ;;  %s497_s23 = sshll.u32 %s1005_s6, 3 }
  0x46   : > { %s165_s29 = sshll.u32 %s162_s17, 4  ;;  %s874_s24 = sshll.u32 %s151_s26, 4  ;;  %s876_s29 = int_to_ptr.hbm [resolvable:$true] %s165_s29  ;;  %s168_s24 = int_to_ptr.vmem [resolvable:$true] %s874_s24 }
  0x47   : > { %s514_s27 = sshll.u32 %s1005_s6, 9  ;;  %s602_s25 = sshra.s32 %s876_s29, 4  ;;  %s603_s25 = int_to_ptr.hbm [resolvable:$true] %s602_s25 }
  0x48   : > { %s604_s3 = sshrl.u32 %s514_s27, 4  ;;  %s613_s8 = scalar_lea.hbm %s987_s1, 96 }
  0x49   : > { %s609_s5 = scalar_lea.hbm %s603_s25, %s604_s3  ;;  %p614_p3 = scmp.lt.s32.totalorder %s603_s25, %s987_s1 }
  0x4a   : > { %p610_p11 = scmp.ne.s32.totalorder %s603_s25, %s609_s5  ;;  %p615_p4 = scmp.lt.s32.totalorder %s613_s8, %s609_s5 }
  0x4c   : > { %p611_p13 = pnand %p610_p11, %p865_p5  ;;  %p616_p7 = por %p615_p4, %p614_p3 }
  0x4e   : > { %p612_p2 = pneg %p611_p13 }
  0x50   : > { %p617_p8 = pnand %p616_p7, %p612_p2 }
  0x52   : > { %620 = shalt.err (!%p617_p8)
}
  0x53   : > { %s621_s14 = sshra.s32 %s168_s24, 4  ;;  %s727_s17 = smov [#allocation5]   ;;  %s622_s14 = int_to_ptr.vmem [resolvable:$true] %s621_s14 }
  0x54   : > { %s628_s16 = scalar_lea.vmem %s622_s14, %s604_s3  ;;  %s632_s7 = scalar_lea.vmem %s727_s17, 128 }
  0x55   : > { %p629_p12 = scmp.ne.s32.totalorder %s622_s14, %s628_s16  ;;  %p634_p10 = scmp.lt.s32.totalorder %s632_s7, %s628_s16 }
  0x57   : > { %p630_p0 = pnand %p629_p12, %p865_p5 }
  0x59   : > { %p631_p1 = pneg %p630_p0 }
  0x5b   : > { %p636_p11 = pnand %p634_p10, %p631_p1 }
  0x5d   : > { %639 = shalt.err (!%p636_p11)
}
  0x5e   : > { %s728_s25 = smov 384   ;;  %s729_s5 = smov 256  }
  0x5f   : > { %173 = dma.hbm_to_vmem [thread:$0]  (%p865_p5), %s876_s29, %s514_s27, %s168_s24, %s862_s28, %s728_s25, %s729_s5, %s497_s23  }
  0x60 PF: > { %p500_p13 = scmp.ge.s32.totalorder %s722_s12, 1  ;;  %p175_p2 = scmp.lt.s32.totalorder %s722_s12, 3 }
  0x62   : > { %p176_p3 = pnand %p500_p13, %p175_p2 }
  0x63   : > { %s908_s3 = sand.u32 (!%p176_p3), 1, %s714_s10  }
  0x64   : > { %179 = sbr.rel (%p176_p3) target bundleno = 191 (0xbf), region = 28  ;;  %s501_s4 = sshll.u32 (!%p176_p3), %s908_s3, 6 }
  0x65   : > { %s182_s19 = scalar_lea.sflag (!%p176_p3), [#allocation3], %s908_s3  ;;  %s185_s8 = scalar_lea.vmem (!%p176_p3), [#allocation2], %s501_s4 }
  0x69   : > { %697 = dma.done.wait (%p789_p6), %s182_s19, 1024  }
  0x6a   : > { %699 = vsyncadd (%p789_p6), %s182_s19, 4294966272  ;;  %s192_s6 = scalar_lea.sflag [#allocation6], %s908_s3  ;;  %s917_s28 = scalar_lea.vmem [#allocation5], %s501_s4 }
  0x6b   : > { %701 = dma.done.wait (%p789_p6), %s192_s6, 1024  }
  0x6c   : > { %703 = vsyncadd (%p789_p6), %s192_s6, 4294966272  ;;  %v236_v0 = vld [vmem:[%s185_s8] sm:$0xff]  ;;  %v237_v1 = vld [vmem:[%s185_s8 + $0x8] sm:$0xff]  ;;  %s503_s20 = sshll.u32 %s908_s3, 1  ;;  %vm359_vm6 = vcmask 1040384   ;;  %s368_s29 = scalar_lea.sflag [#allocation4], %s908_s3 }
  0x6d   : > { %v238_v2 = vld [vmem:[%s185_s8 + $0x10] sm:$0xff]  ;;  %v239_v3 = vld [vmem:[%s185_s8 + $0x18] sm:$0xff]  ;;  %v240_v4 = vld [vmem:[%s185_s8 + $0x20] sm:$0xff]  ;;  %v278_v6 = vmul.f32 %v236_v0, %v236_v0  ;;  %v279_v7 = vmul.f32 %v237_v1, %v237_v1  ;;  %s221_s23 = scalar_lea.vmem [#allocation7], %s503_s20  ;;  %s505_s24 = sshll.u32 (%p794_p9), %s767_s13, 1 }
  0x6e   : > { %v241_v5 = vld [vmem:[%s185_s8 + $0x28] sm:$0xff]  ;;  %v280_v8 = vmul.f32 %v238_v2, %v238_v2  ;;  %v242_v9 = vld [vmem:[%s185_s8 + $0x30] sm:$0xff]  ;;  %v243_v10 = vld [vmem:[%s185_s8 + $0x38] sm:$0xff]  ;;  %v281_v11 = vmul.f32 %v239_v3, %v239_v3  ;;  %v282_v12 = vmul.f32 %v240_v4, %v240_v4  ;;  %s376_s27 = ssub.s32 (%p794_p9), 3, %s505_s24 }
  0x6f   : > { %v283_v13 = vmul.f32 %v241_v5, %v241_v5  ;;  %v284_v14 = vmul.f32 %v242_v9, %v242_v9  ;;  %v244_v16 = vld [vmem:[%s917_s28] sm:$0xff]  ;;  %v245_v17 = vld [vmem:[%s917_s28 + $0x8] sm:$0xff]  ;;  %v246_v18 = vld [vmem:[%s917_s28 + $0x10] sm:$0xff]  ;;  %v285_v19 = vmul.f32 %v243_v10, %v243_v10  ;;  %p377_p6 = scmp.lt.s32.totalorder (%p794_p9), %s376_s27, 2 }
  0x70   : > { %v286_v15 = vadd.f32 %v280_v8, %v278_v6  ;;  %v295_v20 = vadd.f32 %v281_v11, %v279_v7  ;;  %v247_v21 = vld [vmem:[%s917_s28 + $0x18] sm:$0xff]  ;;  %v248_v23 = vld [vmem:[%s917_s28 + $0x20] sm:$0xff]  ;;  %v249_v24 = vld [vmem:[%s917_s28 + $0x28] sm:$0xff]  ;;  %v304_v28 = vmul.f32 %v244_v16, %v244_v16  ;;  %v305_v29 = vmul.f32 %v245_v17, %v245_v17 }
  0x71   : > { %v250_v26 = vld [vmem:[%s917_s28 + $0x30] sm:$0xff]  ;;  %v306_v30 = vmul.f32 %v246_v18, %v246_v18  ;;  %v251_v31 = vld [vmem:[%s917_s28 + $0x38] sm:$0xff]  ;;  %v307_v33 = vmul.f32 %v247_v21, %v247_v21  ;;  %v308_v35 = vmul.f32 %v248_v23, %v248_v23  ;;  %v309_v36 = vmul.f32 %v249_v24, %v249_v24 }
  0x72   : > { %v287_v22 = vadd.f32 %v286_v15, %v282_v12  ;;  %v296_v25 = vadd.f32 %v295_v20, %v283_v13  ;;  %v252_v37 = vmul.f32 %v244_v16, %v236_v0  ;;  %v254_v38 = vmul.f32 %v246_v18, %v238_v2 }
  0x73   : > { %v310_v40 = vmul.f32 %v250_v26, %v250_v26  ;;  %v311_v42 = vmul.f32 %v251_v31, %v251_v31  ;;  %v312_v43 = vadd.f32 %v306_v30, %v304_v28  ;;  %v321_v44 = vadd.f32 %v307_v33, %v305_v29 }
  0x74   : > { %v288_v27 = vadd.f32 %v287_v22, %v284_v14  ;;  %v297_v32 = vadd.f32 %v296_v25, %v285_v19  ;;  %v253_v45 = vmul.f32 %v245_v17, %v237_v1  ;;  %v255_v46 = vmul.f32 %v247_v21, %v239_v3 }
  0x75   : > { %v313_v49 = vadd.f32 %v312_v43, %v308_v35  ;;  %v322_v50 = vadd.f32 %v321_v44, %v309_v36  ;;  %v256_v52 = vmul.f32 %v248_v23, %v240_v4  ;;  %v260_v53 = vadd.f32 %v254_v38, %v252_v37 }
  0x76   : > { %v289_v34 = vrot.slane %v288_v27, 4  ;;  %v298_v39 = vrot.slane %v297_v32, 4  ;;  %v257_v56 = vmul.f32 %v249_v24, %v241_v5  ;;  %v269_v57 = vadd.f32 %v255_v46, %v253_v45 }
  0x77   : > { %v314_v54 = vadd.f32 %v313_v49, %v310_v40  ;;  %v323_v55 = vadd.f32 %v322_v50, %v311_v42  ;;  %v258_v62 = vmul.f32 %v250_v26, %v242_v9  ;;  %v261_v63 = vadd.f32 %v260_v53, %v256_v52 }
  0x78   : > { %v290_v41 = vadd.f32 %v289_v34, %v288_v27  ;;  %v299_v47 = vadd.f32 %v298_v39, %v297_v32  ;;  %v259_v2 = vmul.f32 %v251_v31, %v243_v10  ;;  %v270_v3 = vadd.f32 %v269_v57, %v257_v56 }
  0x79   : > { %v315_v60 = vrot.slane %v314_v54, 4  ;;  %v324_v61 = vrot.slane %v323_v55, 4  ;;  %v262_v4 = vadd.f32 %v261_v63, %v258_v62 }
  0x7a   : > { %v291_v48 = vrot.slane %v290_v41, 2  ;;  %v300_v51 = vrot.slane %v299_v47, 2  ;;  %v271_v14 = vadd.f32 %v270_v3, %v259_v2 }
  0x7b   : > { %v316_v0 = vadd.f32 %v315_v60, %v314_v54  ;;  %v325_v1 = vadd.f32 %v324_v61, %v323_v55  ;;  %v263_v18 = vrot.slane %v262_v4, 4 }
  0x7c   : > { %v292_v58 = vadd.f32 %v291_v48, %v290_v41  ;;  %v301_v59 = vadd.f32 %v300_v51, %v299_v47  ;;  %v272_v20 = vrot.slane %v271_v14, 4  ;;  %v362_v47 = vlaneseq }
  0x7d   : > { %v317_v8 = vrot.slane %v316_v0, 2  ;;  %v326_v11 = vrot.slane %v325_v1, 2  ;;  %v264_v10 = vadd.f32 %v263_v18, %v262_v4 }
  0x7e   : > { %v293_v6 = vrot.slane %v292_v58, 1  ;;  %v302_v7 = vrot.slane %v301_v59, 1  ;;  %v273_v25 = vadd.f32 %v272_v20, %v271_v14  ;;  %vm364_vm7 = vcmp.lt.s32.totalorder %v362_v47, 256 }
  0x7f   : > { %v318_v12 = vadd.f32 %v317_v8, %v316_v0  ;;  %v327_v13 = vadd.f32 %v326_v11, %v325_v1  ;;  %v265_v26 = vrot.slane %v264_v10, 2 }
  0x80   : > { %v294_v5 = vadd.f32 %v293_v6, %v292_v58  ;;  %v303_v15 = vadd.f32 %v302_v7, %v301_v59  ;;  %v274_v27 = vrot.slane %v273_v25, 2 }
  0x81   : > { %v319_v16 = vrot.slane %v318_v12, 1  ;;  %v328_v17 = vrot.slane %v327_v13, 1  ;;  %v266_v29 = vadd.f32 %v265_v26, %v264_v10 }
  0x82   : > { %v275_v31 = vadd.f32 %v274_v27, %v273_v25 }
  0x83   : > { %v320_v19 = vadd.f32 %v319_v16, %v318_v12  ;;  %v329_v9 = vadd.f32 %v328_v17, %v327_v13  ;;  %v267_v35 = vrot.slane %v266_v29, 1 }
  0x84   : > { %v276_v37 = vrot.slane %v275_v31, 1 }
  0x85   : > { %v330_v21 = vmul.f32 %v320_v19, %v294_v5  ;;  %v331_v22 = vmul.f32 %v329_v9, %v303_v15  ;;  %v268_v42 = vadd.f32 %v267_v35, %v266_v29 }
  0x86   : > { %v277_v43 = vadd.f32 %v276_v37, %v275_v31 }
  0x87   : > { %v332_v23 = vmax.f32 %v330_v21, 1e-16  ;;  %v333_v24 = vmax.f32 %v331_v22, 1e-16 }
  0x89   : > { %559 = vrsqrt.f32 %v332_v23  ;;  %vm340_vm0 = vweird.f32 %v332_v23  ;;  %vm350_vm2 = vweird.f32 %v333_v24 }
  0x8a   : > { %561 = vrsqrt.f32 %v333_v24 }
  0x8f   : > { %v560_v28 = vpop.eup %559 }
  0x90   : > { %v562_v30 = vpop.eup %561  ;;  %v335_v32 = vmul.f32 %v560_v28, %v332_v23  ;;  %vm341_vm1 = vweird.f32 %v560_v28 }
  0x91   : > { %v345_v33 = vmul.f32 %v562_v30, %v333_v24  ;;  %vm351_vm3 = vweird.f32 %v562_v30  ;;  %vm342_vm4 = vmor %vm340_vm0, %vm341_vm1 }
  0x92   : > { %v336_v34 = vmul.f32 %v560_v28, %v335_v32  ;;  %vm352_vm5 = vmor %vm350_vm2, %vm351_vm3 }
  0x93   : > { %v346_v36 = vmul.f32 %v562_v30, %v345_v33 }
  0x94   : > { %v337_v38 = vmul.f32 0.5, %v336_v34 }
  0x95   : > { %v347_v39 = vmul.f32 0.5, %v346_v36 }
  0x96   : > { %v338_v40 = vsub.f32 1.5, %v337_v38 }
  0x97   : > { %v348_v41 = vsub.f32 1.5, %v347_v39 }
  0x98   : > { %v339_v44 = vmul.f32 %v560_v28, %v338_v40 }
  0x99   : > { %v349_v45 = vmul.f32 %v562_v30, %v348_v41 }
  0x9a   : > { %v343_v46 = vsel %vm342_vm4, %v560_v28, %v339_v44 }
  0x9b   : > { %v353_v48 = vsel %vm352_vm5, %v562_v30, %v349_v45  ;;  %v354_v49 = vmul.f32 %v343_v46, %v268_v42 }
  0x9c   : > { %v355_v50 = vmul.f32 %v353_v48, %v277_v43 }
  0x9d   : > { %374 = sbr.rel (!%p794_p9) target bundleno = 191 (0xbf), region = 40 }
  0x9e   : > { %v358_v51 = vrot.slane %v355_v50, 7 }
  0xa0   : > { %v360_v52 = vsel %vm359_vm6, %v354_v49, %v358_v51 }
  0xa1   : > { %366 = vst.msk [vmem:[%s221_s23] sm:$0x3] %vm364_vm7, %v360_v52 }
  0xa2   : > { %s1007_s27 = smov (!%p377_p6, %s376_s27), 2 }
  0xa3   : > { %s379_s26 = ssub.s32 2, %s1007_s27 }
  0xa4   : > { %s380_s30 = sshll.u32 %s379_s26, 4 }
  0xa5   : > { %381 = vsyncadd %s368_s29, %s380_s30  ;;  %p506_p5 = scmp.ne.s32.totalorder %s1007_s27, 0  ;;  %s383_s16 = scalar_lea.hbm %s988_s2, %s505_s24 }
  0xa6   : > { %s384_s17 = sshll.u32 %s1007_s27, 4  ;;  %s385_s13 = sshll.u32 %s221_s23, 4  ;;  %s946_s13 = int_to_ptr.vmem [resolvable:$true] %s385_s13 }
  0xa7   : > { %s387_s7 = sshll.u32 %s383_s16, 4  ;;  %s641_s25 = sshra.s32 %s946_s13, 4  ;;  %s388_s7 = int_to_ptr.hbm [resolvable:$true] %s387_s7  ;;  %s642_s25 = int_to_ptr.vmem [resolvable:$true] %s641_s25 }
  0xa8   : > { %s643_s5 = sshrl.u32 %s384_s17, 4  ;;  %s730_s19 = smov [#allocation7]  }
  0xa9   : > { %s648_s4 = scalar_lea.vmem %s642_s25, %s643_s5  ;;  %s652_s8 = scalar_lea.vmem %s730_s19, 4 }
  0xaa   : > { %p649_p9 = scmp.ne.s32.totalorder %s642_s25, %s648_s4  ;;  %p654_p8 = scmp.lt.s32.totalorder %s652_s8, %s648_s4 }
  0xac   : > { %p650_p4 = pnand %p649_p9, %p506_p5 }
  0xae   : > { %p651_p7 = pneg %p650_p4 }
  0xb0   : > { %p656_p12 = pnand %p654_p8, %p651_p7 }
  0xb2   : > { %659 = shalt.err (!%p656_p12)
}
  0xb3   : > { %s660_s6 = sshra.s32 %s388_s7, 4  ;;  %s671_s24 = scalar_lea.hbm %s988_s2, 3  ;;  %s661_s6 = int_to_ptr.hbm [resolvable:$true] %s660_s6 }
  0xb4   : > { %s667_s28 = scalar_lea.hbm %s661_s6, %s643_s5  ;;  %p672_p11 = scmp.lt.s32.totalorder %s661_s6, %s988_s2 }
  0xb5   : > { %p668_p0 = scmp.ne.s32.totalorder %s661_s6, %s667_s28  ;;  %p673_p13 = scmp.lt.s32.totalorder %s671_s24, %s667_s28 }
  0xb7   : > { %p669_p1 = pnand %p668_p0, %p506_p5  ;;  %p674_p2 = por %p673_p13, %p672_p11 }
  0xb9   : > { %p670_p10 = pneg %p669_p1 }
  0xbb   : > { %p675_p3 = pnand %p674_p2, %p670_p10 }
  0xbd   : > { %678 = shalt.err (!%p675_p3)
}
  0xbe   : > { %390 = dma.vmem_to_hbm [thread:$0]  (%p506_p5), %s946_s13, %s384_s17, %s388_s7, %s368_s29  }
  0xbf PF: > { %s399_s14 = sand.u32 1, %s710_s9   ;;  %p996_p6 = scmp.ne.s32.totalorder %s993_s22, 0 }
  0xc0   : > { %p997_p9 = scmp.ge.s32.totalorder %s722_s12, 2  ;;  %s400_s21 = scalar_lea.sflag [#allocation4], %s399_s14 }
  0xc2   : > { %p519_p4 = pnand %p997_p9, %p996_p6 }
  0xc4   : > { %p520_p7 = pneg %p519_p4 }
  0xc6   : > { %705 = dma.done.wait (%p520_p7), %s400_s21, 32  }
  0xc7   : > { %707 = vsyncadd (%p520_p7), %s400_s21, 4294967264  ;;  %p18_p8 = scmp.ge.s32.totalorder %s771_s15, 4   ;;  %s998_s9 = smov %s714_s10 }
  0xc8   : > { %s999_s10 = smov %s718_s11  ;;  %s1000_s11 = smov %s783_s18 }
  0xc9   : > { %s1001_s12 = smov %s771_s15  ;;  %20 = sbr.rel (!%p18_p8) target bundleno = 7 (0x7), region = 86 }
  0xce   :  { %406 = vsyncpa [#allocation3], 1 }
  0xcf   :  { %408 = vsyncpa [#allocation3 + $0x1], 1 }
  0xd0   :  { %409 = vsyncpa [#allocation6], 1 }
  0xd1   :  { %411 = vsyncpa [#allocation6 + $0x1], 1 }
  0xd2   :  { %412 = vsyncpa [#allocation4], 1 }
  0xd3   :  { %414 = vsyncpa [#allocation4 + $0x1], 1 }

</bundles_post_ra>
